<compile_context>
chip_gen: v7x
topology: tpu7x:2x2x1
jax: 0.10.0
libtpu: 0.0.40
codegen_flags: <defaults>
</compile_context>

<pallas_src>
import functools

import jax
import jax.numpy as jnp
from jax.experimental import pallas as pl
from jax.experimental.pallas import tpu as pltpu

LANE = 128
SUBLANE = 8
ROW_ALIGN = 32          # int8 score stream needs (32, 128) tiles
MAX_BLOCK_ROWS = 512    # (512, 128) f32 block = 256 KiB per f32 operand


def _irt_kernel(z_ref, score_ref, pred_ref, part_ref, *, block_rows):
    z = z_ref[...]                               # [block_rows, 128] f32 logits

    # Single transcendental exp shared by sigmoid and BCE.
    e = jnp.exp(-jnp.abs(z))
    denom = 1.0 + e                              # in (1, 2]

    # pred = sigmoid(z): numerically-stable two-sided form; approx reciprocal
    # plus one Newton step (rel. err ~1e-7) instead of a full-precision divide.
    r = pl.reciprocal(denom, approx=True)
    r = r * (2.0 - denom * r)
    pred_ref[...] = jnp.where(z >= 0.0, 1.0, e) * r

    # BCE from logits: max(z,0) - z*y + log(1 + exp(-|z|)), y in {0,1} (int8).
    y_nz = score_ref[...] != 0
    bce = jnp.maximum(z, 0.0) - jnp.where(y_nz, z, 0.0) + jnp.log(denom)

    # Per-block partial sums, folded sublane-wise (tile-aligned VPU adds only);
    # the final scalar reduction and 1/B scaling happen in XLA.
    part_ref[...] = jnp.sum(
        bce.reshape(block_rows // SUBLANE, SUBLANE, LANE), axis=0)


def irt_forward(user_emb, a_emb, b_emb, user_id, item_id, score,
                *, max_block_rows=MAX_BLOCK_ROWS):
    """Returns {'prediction': [B] f32, 'loss': scalar f32}."""
    B = user_id.shape[0]

    rows = pl.cdiv(B, LANE)
    num_blocks = pl.cdiv(rows, max_block_rows)
    block_rows = pl.cdiv(pl.cdiv(rows, num_blocks), ROW_ALIGN) * ROW_ALIGN
    rows_p = num_blocks * block_rows
    Bp = rows_p * LANE

    # TODO(synk): the per-example embedding gathers (data-dependent rows of tiny
    # [N,1] tables) stay in XLA; they fuse with the z computation / pack below.
    theta = user_emb[user_id, 0].astype(jnp.float32)     # [B]
    alpha = a_emb[item_id, 0].astype(jnp.float32)        # [B]
    beta = b_emb[item_id, 0].astype(jnp.float32)         # [B]
    z = alpha * (theta - beta)                           # [B] logits (fused by XLA)
    # TODO(synk): score is assumed binary {0,1} (IRT correctness labels); a
    # continuous BCE target would require keeping an f32 score stream instead.
    score_i8 = score.astype(jnp.int8)                    # [B]

    def pack(v, fill):
        return jnp.pad(v, (0, Bp - B), constant_values=fill).reshape(rows_p, LANE)

    # Pad with (z=+100, y=1): max(100,0) - 100*1 + log(1 + exp(-100)) == 0.0
    # exactly in f32, so padded lanes add nothing to the loss — no mask needed.
    z_p = pack(z, 100.0)
    s_p = pack(score_i8, 1)

    blk = pl.BlockSpec((block_rows, LANE), lambda g: (g, 0))
    part_blk = pl.BlockSpec((SUBLANE, LANE), lambda g: (g, 0))

    pred_p, part = pl.pallas_call(
        functools.partial(_irt_kernel, block_rows=block_rows),
        grid=(num_blocks,),
        in_specs=[blk, blk],
        out_specs=(blk, part_blk),
        out_shape=(
            jax.ShapeDtypeStruct((rows_p, LANE), jnp.float32),
            jax.ShapeDtypeStruct((num_blocks * SUBLANE, LANE), jnp.float32),
        ),
        compiler_params=pltpu.CompilerParams(
            # No cross-step accumulator -> row-block axis can shard across
            # v7x's two TensorCores; no-op on single-TC v5e/v6e.
            dimension_semantics=("parallel",)),
    )(z_p, s_p)

    loss = jnp.sum(part) * (1.0 / B)
    return {"prediction": pred_p.reshape(Bp)[:B], "loss": loss}


def xavier_uniform(key, shape):
    # nn.init.xavier_uniform_ on a (num_embeddings, dim) weight:
    # fan_in = dim, fan_out = num_embeddings, bound = sqrt(6 / (fan_in + fan_out))
    fan_out, fan_in = shape
    bound = (6.0 / (fan_in + fan_out)) ** 0.5
    return jax.random.uniform(key, shape, jnp.float32, -bound, bound)


if __name__ == "__main__":
    USER_NUM, ITEM_NUM, B = 32, 64, 8

    key = jax.random.PRNGKey(0)
    k_user, k_a, k_b, k_uid, k_iid, k_score = jax.random.split(key, 6)

    # Deterministic parameter init (same shapes as the PyTorch module).
    user_emb = xavier_uniform(k_user, (USER_NUM, 1))
    a_emb = xavier_uniform(k_a, (ITEM_NUM, 1))
    b_emb = xavier_uniform(k_b, (ITEM_NUM, 1))

    user_id = jax.random.randint(k_uid, (B,), 0, USER_NUM)
    item_id = jax.random.randint(k_iid, (B,), 0, ITEM_NUM)
    score = jax.random.bernoulli(k_score, 0.5, (B,)).astype(jnp.float32)

    out = irt_forward(user_emb, a_emb, b_emb, user_id, item_id, score)
    jax.block_until_ready(out)

    # Pure-JAX reference check (log clamped at -100, matching nn.BCELoss).
    theta = user_emb[user_id, 0]
    alpha = a_emb[item_id, 0]
    beta = b_emb[item_id, 0]
    pred_ref = jax.nn.sigmoid(alpha * (theta - beta))
    log_p = jnp.maximum(jnp.log(pred_ref), -100.0)
    log_1mp = jnp.maximum(jnp.log(1.0 - pred_ref), -100.0)
    loss_ref = jnp.mean(-(score * log_p + (1.0 - score) * log_1mp))

    assert jnp.allclose(out["prediction"], pred_ref, atol=1e-5)
    assert jnp.allclose(out["loss"], loss_ref, atol=1e-5)

    print("KERNEL_OK")
</pallas_src>

<mosaic_0001>
module attributes {stable_mosaic.version = 11 : i64} {
  func.func @_irt_kernel(%arg0: i32, %arg1: memref<32x128xf32, #tpu.memory_space<vmem>>, %arg2: memref<32x128xi8, #tpu.memory_space<vmem>>, %arg3: memref<32x128xf32, #tpu.memory_space<vmem>>, %arg4: memref<8x128xf32, #tpu.memory_space<vmem>>) attributes {dimension_semantics = [#tpu.dimension_semantics<parallel>], iteration_bounds = array<i64: 1>, scalar_prefetch = 0 : i64, scratch_operands = 0 : i64, tpu.core_type = #tpu.core_type<tc>, window_params = [{transform_indices = @transform_0, window_bounds = array<i64: 32, 128>}, {transform_indices = @transform_1, window_bounds = array<i64: 32, 128>}, {transform_indices = @transform_2, window_bounds = array<i64: 32, 128>}, {transform_indices = @transform_3, window_bounds = array<i64: 8, 128>}]} {
    %c0 = arith.constant 0 : index
    %c0_0 = arith.constant 0 : index
    %0 = vector.load %arg1[%c0, %c0_0] : memref<32x128xf32, #tpu.memory_space<vmem>>, vector<32x128xf32>
    %1 = math.absf %0 : vector<32x128xf32>
    %cst = arith.constant 0.000000e+00 : f32
    %2 = vector.broadcast %cst : f32 to vector<32x128xf32>
    %3 = arith.subf %2, %1 : vector<32x128xf32>
    %4 = math.exp %3 : vector<32x128xf32>
    %cst_1 = arith.constant 1.000000e+00 : f32
    %5 = vector.broadcast %cst_1 : f32 to vector<32x128xf32>
    %6 = arith.addf %5, %4 : vector<32x128xf32>
    %7 = tpu.reciprocal %6 {approx = true} : vector<32x128xf32> -> vector<32x128xf32>
    %8 = arith.mulf %6, %7 : vector<32x128xf32>
    %cst_2 = arith.constant 2.000000e+00 : f32
    %9 = vector.broadcast %cst_2 : f32 to vector<32x128xf32>
    %10 = arith.subf %9, %8 : vector<32x128xf32>
    %11 = arith.mulf %7, %10 : vector<32x128xf32>
    %cst_3 = arith.constant 0.000000e+00 : f32
    %12 = vector.broadcast %cst_3 : f32 to vector<32x128xf32>
    %13 = arith.cmpf oge, %0, %12 : vector<32x128xf32>
    %cst_4 = arith.constant 1.000000e+00 : f32
    %14 = vector.broadcast %cst_4 : f32 to vector<32x128xf32>
    %15 = arith.select %13, %14, %4 : vector<32x128xi1>, vector<32x128xf32>
    %16 = arith.mulf %15, %11 : vector<32x128xf32>
    %c0_5 = arith.constant 0 : index
    %c0_6 = arith.constant 0 : index
    %17 = vector.load %arg3[%c0_5, %c0_6] : memref<32x128xf32, #tpu.memory_space<vmem>>, vector<32x128xf32>
    tpu.vector_store %arg3[%c0_5, %c0_6], %16 {strides = array<i32>} : memref<32x128xf32, #tpu.memory_space<vmem>>, vector<32x128xf32>,
    %c0_7 = arith.constant 0 : index
    %c0_8 = arith.constant 0 : index
    %18 = vector.load %arg2[%c0_7, %c0_8] : memref<32x128xi8, #tpu.memory_space<vmem>>, vector<32x128xi8>
    %c0_i8 = arith.constant 0 : i8
    %19 = vector.broadcast %c0_i8 : i8 to vector<32x128xi8>
    %20 = arith.cmpi ne, %18, %19 : vector<32x128xi8>
    %cst_9 = arith.constant 0.000000e+00 : f32
    %21 = vector.broadcast %cst_9 : f32 to vector<32x128xf32>
    %22 = arith.maximumf %0, %21 : vector<32x128xf32>
    %cst_10 = arith.constant 0.000000e+00 : f32
    %23 = vector.broadcast %cst_10 : f32 to vector<32x128xf32>
    %24 = arith.select %20, %0, %23 : vector<32x128xi1>, vector<32x128xf32>
    %25 = arith.subf %22, %24 : vector<32x128xf32>
    %26 = math.log %6 : vector<32x128xf32>
    %27 = arith.addf %25, %26 : vector<32x128xf32>
    %28 = vector.shape_cast %27 : vector<32x128xf32> to vector<4x8x128xf32>
    %cst_11 = arith.constant dense<0.000000e+00> : vector<8x128xf32>
    %29 = vector.multi_reduction <add>, %28, %cst_11 [0] : vector<4x8x128xf32> to vector<8x128xf32>
    %c0_12 = arith.constant 0 : index
    %c0_13 = arith.constant 0 : index
    %30 = vector.load %arg4[%c0_12, %c0_13] : memref<8x128xf32, #tpu.memory_space<vmem>>, vector<8x128xf32>
    tpu.vector_store %arg4[%c0_12, %c0_13], %29 {strides = array<i32>} : memref<8x128xf32, #tpu.memory_space<vmem>>, vector<8x128xf32>,
    return
  }
  func.func @transform_0(%arg0: i32) -> (i32, i32) {
    %c0_i32 = arith.constant 0 : i32
    %c0_i32_0 = arith.constant 0 : i32
    return %arg0, %c0_i32 : i32, i32
  }
  func.func @transform_1(%arg0: i32) -> (i32, i32) {
    %c0_i32 = arith.constant 0 : i32
    %c0_i32_0 = arith.constant 0 : i32
    return %arg0, %c0_i32 : i32, i32
  }
  func.func @transform_2(%arg0: i32) -> (i32, i32) {
    %c0_i32 = arith.constant 0 : i32
    %c0_i32_0 = arith.constant 0 : i32
    return %arg0, %c0_i32 : i32, i32
  }
  func.func @transform_3(%arg0: i32) -> (i32, i32) {
    %c0_i32 = arith.constant 0 : i32
    %c0_i32_0 = arith.constant 0 : i32
    return %arg0, %c0_i32 : i32, i32
  }
}

</mosaic_0001>

<bundles_post_ra>
// kernel: tpu_custom_call.1
= control target key start
LH: loop header
LB: loop body
LE: loop exit
PB: predicated region body
PF: predicated region fallthrough
CT: control target
= control target key end

     0   :  { %9 = vsyncpa [#allocation3], 0  ;;  %s452_s0 = inlined_call_operand.hbm [shape: f32[32,128], index: 0, kind: input, shape index: {}]   ;;  %s453_s1 = inlined_call_operand.hbm [shape: s8[32,128], index: 1, kind: input, shape index: {}]   ;;  %s454_s2 = inlined_call_operand.hbm [shape: f32[32,128], index: 2, kind: output, shape index: {0}]   ;;  %s455_s3 = inlined_call_operand.hbm [shape: f32[8,128], index: 3, kind: output, shape index: {1}]  }
   0x1   :  { %10 = vsyncpa [#allocation6], 0 }
   0x2   :  { %11 = vsyncpa [#allocation4], 0 }
   0x3   :  { %12 = vsyncpa [#allocation9], 0  ;;  %s317_s12 = smov [#allocation2]   ;;  %s221_s16 = scalar_lea.hbm %s452_s0, 512 }
   0x4   :  { %s18_s13 = sshll.u32 %s317_s12, 4  ;;  %p222_p0 = scmp.ne.s32.totalorder %s452_s0, %s221_s16  ;;  %s19_s13 = int_to_ptr.vmem [resolvable:$true] %s18_s13 }
   0x5   :  { %p225_p1 = scmp.lt.u32.totalorder %s221_s16, %s452_s0 }
   0x7   :  { %p227_p2 = pnand %p225_p1, %p222_p0 }
   0x9   :  { %230 = shalt.err (!%p227_p2)
}
   0xa   :  { %s231_s21 = scalar_lea.vmem %s19_s13, 512  ;;  %p236_p4 = scmp.lt.s32.totalorder %s19_s13, %s19_s13 }
   0xb   :  { %p232_p3 = scmp.ne.s32.totalorder %s19_s13, %s231_s21  ;;  %p237_p5 = scmp.lt.s32.totalorder %s231_s21, %s231_s21 }
   0xd   :  { %p238_p6 = por %p237_p5, %p236_p4 }
   0xf   :  { %p239_p7 = pnand %p238_p6, %p232_p3 }
  0x11   :  { %242 = shalt.err (!%p239_p7)
}
  0x12   :  { %s318_s22 = smov 128   ;;  %s319_s23 = smov 8  }
  0x13   :  { %24 = dma.hbm_to_vmem [thread:$0]  %s452_s0, 512, %s19_s13, [#allocation3], %s318_s22, %s318_s22, %s319_s23  }
  0x14   :  { %s320_s26 = smov [#allocation5]   ;;  %s243_s30 = scalar_lea.hbm %s453_s1, 128 }
  0x15   :  { %s31_s27 = sshll.u32 %s320_s26, 4  ;;  %p244_p8 = scmp.ne.s32.totalorder %s453_s1, %s243_s30  ;;  %s32_s27 = int_to_ptr.vmem [resolvable:$true] %s31_s27 }
  0x16   :  { %p247_p9 = scmp.lt.u32.totalorder %s243_s30, %s453_s1 }
  0x18   :  { %p249_p10 = pnand %p247_p9, %p244_p8 }
  0x1a   :  { %252 = shalt.err (!%p249_p10)
}
  0x1b   :  { %s253_s8 = scalar_lea.vmem %s32_s27, 128  ;;  %p258_p12 = scmp.lt.s32.totalorder %s32_s27, %s32_s27 }
  0x1c   :  { %p254_p11 = scmp.ne.s32.totalorder %s32_s27, %s253_s8  ;;  %p259_p13 = scmp.lt.s32.totalorder %s253_s8, %s253_s8 }
  0x1e   :  { %p260_p0 = por %p259_p13, %p258_p12 }
  0x20   :  { %p261_p1 = pnand %p260_p0, %p254_p11 }
  0x22   :  { %264 = shalt.err (!%p261_p1)
}
  0x23   :  { %34 = dma.hbm_to_vmem [thread:$0]  %s453_s1, 128, %s32_s27, [#allocation6]  }
  0x24   :  { %309 = dma.done.wait [#allocation3], 512  }
  0x25   :  { %310 = vsyncadd [#allocation3], 4294966784 }
  0x26   :  { %311 = dma.done.wait [#allocation6], 128  }
  0x27   :  { %312 = vsyncadd [#allocation6], 4294967168  ;;  %v371_v0 = vld [vmem:[#allocation2] sm:$0xff]  ;;  %v373_v1 = vld [vmem:[#allocation2 + $0x8] sm:$0xff]  ;;  %v321_v16 = vmov 0   ;;  %s322_s1 = smov [#allocation7]  }
  0x28   :  { %v375_v2 = vld [vmem:[#allocation2 + $0x10] sm:$0xff]  ;;  %v47_v3 = vand.u32 2147483647, %v371_v0  ;;  %v48_v4 = vand.u32 2147483647, %v373_v1  ;;  %v380_v6 = vld [vmem:[#allocation2 + $0x18] sm:$0xff] }
  0x29   :  { %v49_v5 = vand.u32 2147483647, %v375_v2  ;;  %v99_v7 = vld [vmem:[#allocation5] sm:$0xff]  ;;  %v50_v10 = vand.u32 2147483647, %v380_v6  ;;  %vm83_vm6 = vcmp.ge.f32.partialorder %v371_v0, 0.0 }
  0x2a   :  { %v51_v8 = vsub.f32 0.0, %v47_v3  ;;  %v52_v9 = vsub.f32 0.0, %v48_v4  ;;  %vm100_vm0 = vnez %v99_v7  ;;  %vm84_vm7 = vcmp.ge.f32.partialorder %v373_v1, 0.0  ;;  %s163_s10 = sshll.u32 %s322_s1, 4  ;;  %s323_s11 = smov [#allocation8]   ;;  %s164_s10 = int_to_ptr.vmem [resolvable:$true] %s163_s10 }
  0x2b   :  { %v53_v11 = vsub.f32 0.0, %v49_v5  ;;  %v54_v14 = vsub.f32 0.0, %v50_v10  ;;  %v105_v17 = vsel %vm100_vm0, 16843009, %v321_v16  ;;  %vm85_vm9 = vcmp.ge.f32.partialorder %v375_v2, 0.0  ;;  %s176_s12 = sshll.u32 %s323_s11, 4  ;;  %p270_p3 = scmp.lt.s32.totalorder %s164_s10, %s164_s10  ;;  %s177_s12 = int_to_ptr.vmem [resolvable:$true] %s176_s12 }
  0x2c   :  { %v55_v12 = vmul.f32 1.442695, %v51_v8  ;;  %v57_v13 = vmul.f32 1.442695, %v52_v9  ;;  %v106_v19 = vunpack.c.0.s8 %v105_v17  ;;  %v107_v20 = vunpack.c.1.s8 %v105_v17  ;;  %s265_s13 = scalar_lea.vmem %s164_s10, 512 }
  0x2d   :  { %v59_v15 = vmul.f32 1.442695, %v53_v11  ;;  %v61_v18 = vmul.f32 1.442695, %v54_v14  ;;  %v108_v21 = vunpack.c.2.s8 %v105_v17  ;;  %v109_v22 = vunpack.c.3.s8 %v105_v17  ;;  %p266_p2 = scmp.ne.s32.totalorder %s164_s10, %s265_s13  ;;  %p271_p4 = scmp.lt.s32.totalorder %s265_s13, %s265_s13 }
  0x2e   :  { %197 = vpow2.f32 %v55_v12  ;;  %v110_v23 = vpack.c.b16 %v106_v19, %v106_v19  ;;  %v112_v24 = vpack.c.b16 %v107_v20, %v107_v20  ;;  %vm86_vm10 = vcmp.ge.f32.partialorder %v380_v6, 0.0 }
  0x2f   :  { %199 = vpow2.f32 %v57_v13  ;;  %v114_v25 = vpack.c.b16 %v108_v21, %v108_v21  ;;  %v116_v26 = vpack.c.b16 %v109_v22, %v109_v22  ;;  %v101_v49 = vmax.f32 %v371_v0, 0.0  ;;  %p272_p5 = por %p271_p4, %p270_p3 }
  0x30   :  { %201 = vpow2.f32 %v59_v15  ;;  %v111_v27 = vpack.c.b8 %v110_v23, %v110_v23  ;;  %v113_v28 = vpack.c.b8 %v112_v24, %v112_v24  ;;  %v102_v52 = vmax.f32 %v373_v1, 0.0 }
  0x31   :  { %203 = vpow2.f32 %v61_v18  ;;  %v115_v29 = vpack.c.b8 %v114_v25, %v114_v25  ;;  %v117_v30 = vpack.c.b8 %v116_v26, %v116_v26  ;;  %v103_v53 = vmax.f32 %v375_v2, 0.0  ;;  %p273_p6 = pnand %p272_p5, %p266_p2 }
  0x32   :  { %vm118_vm1 = vnez %v111_v27  ;;  %vm119_vm2 = vnez %v113_v28  ;;  %v104_v59 = vmax.f32 %v380_v6, 0.0 }
  0x33   :  { %vm120_vm3 = vnez %v115_v29  ;;  %vm121_vm4 = vnez %v117_v30  ;;  %v122_v38 = vsel %vm118_vm1, 16843009, %v321_v16  ;;  %v123_v40 = vsel %vm119_vm2, 16843009, %v321_v16 }
  0x34   :  { %v124_v41 = vsel %vm120_vm3, 16843009, %v321_v16  ;;  %v125_v42 = vsel %vm121_vm4, 16843009, %v321_v16  ;;  %v126_v43 = vunpack.c.0.s8 %v122_v38  ;;  %v127_v44 = vunpack.c.0.s8 %v123_v40 }
  0x35   :  { %v128_v45 = vunpack.c.0.s8 %v124_v41  ;;  %v129_v46 = vunpack.c.0.s8 %v125_v42 }
  0x36   :  { %vm383_vm5 = vcmp.ne.s32.totalorder %v126_v43, 0  ;;  %vm389_vm8 = vcmp.ne.s32.totalorder %v127_v44, 0 }
  0x37   :  { %vm396_vm11 = vcmp.ne.s32.totalorder %v128_v45, 0  ;;  %vm402_vm12 = vcmp.ne.s32.totalorder %v129_v46, 0  ;;  %v134_v55 = vsel %vm383_vm5, %v371_v0, 0.0  ;;  %v135_v60 = vsel %vm389_vm8, %v373_v1, 0.0 }
  0x38   :  { %v198_v31 = vpop.eup %197  ;;  %v136_v0 = vsel %vm396_vm11, %v375_v2, 0.0  ;;  %v137_v8 = vsel %vm402_vm12, %v380_v6, 0.0  ;;  %v138_v9 = vsub.f32 %v101_v49, %v134_v55  ;;  %v139_v13 = vsub.f32 %v102_v52, %v135_v60 }
  0x39   :  { %v200_v32 = vpop.eup %199  ;;  %v63_v33 = vadd.f32 1.0, %v198_v31  ;;  %v87_v58 = vsel %vm83_vm6, 1.0, %v198_v31  ;;  %v140_v17 = vsub.f32 %v103_v53, %v136_v0  ;;  %v141_v21 = vsub.f32 %v104_v59, %v137_v8 }
  0x3a   :  { %v202_v34 = vpop.eup %201  ;;  %v64_v35 = vadd.f32 1.0, %v200_v32  ;;  %v88_v63 = vsel %vm84_vm7, 1.0, %v200_v32 }
  0x3b   :  { %v204_v36 = vpop.eup %203  ;;  %205 = vrcp.f32 %v63_v33  ;;  %v65_v37 = vadd.f32 1.0, %v202_v34  ;;  %v89_v3 = vsel %vm85_vm9, 1.0, %v202_v34 }
  0x3c   :  { %207 = vrcp.f32 %v64_v35  ;;  %v66_v39 = vadd.f32 1.0, %v204_v36  ;;  %v90_v1 = vsel %vm86_vm10, 1.0, %v204_v36 }
  0x3d   :  { %209 = vrcp.f32 %v65_v37 }
  0x3e   :  { %211 = vrcp.f32 %v66_v39 }
  0x3f   :  { %213 = vlog2.f32 %v63_v33 }
  0x40   :  { %215 = vlog2.f32 %v64_v35 }
  0x41   :  { %217 = vlog2.f32 %v65_v37 }
  0x42   :  { %219 = vlog2.f32 %v66_v39 }
  0x45   :  { %v206_v51 = vpop.eup %205 }
  0x46   :  { %v208_v56 = vpop.eup %207  ;;  %v71_v57 = vmul.f32 %v206_v51, %v63_v33 }
  0x47   :  { %v210_v61 = vpop.eup %209  ;;  %v72_v62 = vmul.f32 %v208_v56, %v64_v35 }
  0x48   :  { %v212_v4 = vpop.eup %211  ;;  %v75_v5 = vsub.f32 2.0, %v71_v57  ;;  %v73_v7 = vmul.f32 %v210_v61, %v65_v37 }
  0x49   :  { %v214_v10 = vpop.eup %213  ;;  %v76_v11 = vsub.f32 2.0, %v72_v62  ;;  %v74_v12 = vmul.f32 %v212_v4, %v66_v39 }
  0x4a   :  { %v216_v14 = vpop.eup %215  ;;  %v79_v15 = vmul.f32 %v206_v51, %v75_v5  ;;  %v77_v16 = vsub.f32 2.0, %v73_v7  ;;  %v143_v2 = vmul.f32 0.6931472, %v214_v10 }
  0x4b   :  { %v218_v18 = vpop.eup %217  ;;  %v80_v19 = vmul.f32 %v208_v56, %v76_v11  ;;  %v78_v20 = vsub.f32 2.0, %v74_v12  ;;  %v145_v22 = vmul.f32 0.6931472, %v216_v14 }
  0x4c   :  { %v220_v23 = vpop.eup %219  ;;  %v91_v24 = vmul.f32 %v87_v58, %v79_v15  ;;  %v81_v25 = vmul.f32 %v210_v61, %v77_v16  ;;  %v147_v26 = vmul.f32 0.6931472, %v218_v18  ;;  %v150_v27 = vadd.f32 %v143_v2, %v138_v9 }
  0x4d   :  { %v92_v6 = vmul.f32 %v88_v63, %v80_v19  ;;  %v82_v28 = vmul.f32 %v212_v4, %v78_v20  ;;  %v149_v29 = vmul.f32 0.6931472, %v220_v23  ;;  %v151_v30 = vadd.f32 %v145_v22, %v139_v13 }
  0x4e   :  { %95 = vst [vmem:[#allocation7] sm:$0xff] %v91_v24  ;;  %v93_v31 = vmul.f32 %v89_v3, %v81_v25  ;;  %v152_v32 = vadd.f32 %v147_v26, %v140_v17 }
  0x4f   :  { %96 = vst [vmem:[#allocation7 + $0x8] sm:$0xff] %v92_v6  ;;  %v94_v33 = vmul.f32 %v90_v1, %v82_v28  ;;  %v153_v34 = vadd.f32 %v149_v29, %v141_v21  ;;  %v154_v35 = vadd.f32 %v151_v30, %v150_v27 }
  0x50   :  { %97 = vst [vmem:[#allocation7 + $0x10] sm:$0xff] %v93_v31 }
  0x51   :  { %98 = vst [vmem:[#allocation7 + $0x18] sm:$0xff] %v94_v33  ;;  %v155_v36 = vadd.f32 %v154_v35, %v152_v32 }
  0x52   :  { %276 = shalt.err (!%p273_p6)
}
  0x53   :  { %s277_s16 = scalar_lea.hbm %s454_s2, 512 }
  0x54   :  { %p278_p7 = scmp.ne.s32.totalorder %s454_s2, %s277_s16  ;;  %p281_p8 = scmp.lt.u32.totalorder %s277_s16, %s454_s2 }
  0x56   :  { %p283_p9 = pnand %p281_p8, %p278_p7 }
  0x58   :  { %286 = shalt.err (!%p283_p9)
}
  0x59   :  { %169 = dma.vmem_to_hbm [thread:$0]  %s164_s10, 512, %s454_s2, [#allocation4], %s318_s22, %s318_s22, %s319_s23   ;;  %v156_v37 = vadd.f32 %v155_v36, %v153_v34 }
  0x5a   :  { %s287_s25 = scalar_lea.vmem %s177_s12, 128  ;;  %p292_p11 = scmp.lt.s32.totalorder %s177_s12, %s177_s12 }
  0x5b   :  { %157 = vst [vmem:[#allocation8] sm:$0xff] %v156_v37  ;;  %p288_p10 = scmp.ne.s32.totalorder %s177_s12, %s287_s25  ;;  %p293_p12 = scmp.lt.s32.totalorder %s287_s25, %s287_s25 }
  0x5d   :  { %p294_p13 = por %p293_p12, %p292_p11 }
  0x5f   :  { %p295_p0 = pnand %p294_p13, %p288_p10 }
  0x61   :  { %298 = shalt.err (!%p295_p0)
}
  0x62   :  { %s299_s28 = scalar_lea.hbm %s455_s3, 128 }
  0x63   :  { %p300_p1 = scmp.ne.s32.totalorder %s455_s3, %s299_s28  ;;  %p303_p2 = scmp.lt.u32.totalorder %s299_s28, %s455_s3 }
  0x65   :  { %p305_p3 = pnand %p303_p2, %p300_p1 }
  0x67   :  { %308 = shalt.err (!%p305_p3)
}
  0x68   :  { %179 = dma.vmem_to_hbm [thread:$0]  %s177_s12, 128, %s455_s3, [#allocation9]  }
  0x69   :  { %313 = dma.done.wait [#allocation4], 512  }
  0x6a   :  { %314 = vsyncadd [#allocation4], 4294966784 }
  0x6b   :  { %315 = dma.done.wait [#allocation9], 128  }
  0x6c   :  { %316 = vsyncadd [#allocation9], 4294967168 }
  0x6d   :  { %186 = vsyncpa [#allocation3], 1 }
  0x6e   :  { %187 = vsyncpa [#allocation6], 1 }
  0x6f   :  { %188 = vsyncpa [#allocation4], 1 }
  0x70   :  { %189 = vsyncpa [#allocation9], 1 }

</bundles_post_ra>
